<compile_context>
chip_gen: v7x
topology: tpu7x:2x2x1
jax: 0.10.0
libtpu: 0.0.40
codegen_flags: <defaults>
</compile_context>

<pallas_src>
import functools

import jax
import jax.numpy as jnp
from jax import lax
from jax.experimental import pallas as pl
from jax.experimental.pallas import tpu as pltpu

_LOG2E = 1.4426950408889634


def _local_atten_kernel(x_ref, madd_ref, gamma_ref, beta_ref,
                        wq_ref, wk_ref, wv_ref,
                        bq_ref, bk_ref, bv_ref,
                        wproj_ref, bproj_ref,
                        o_ref, proj_ref,
                        *, num_heads, head_dim, block_b, seq, eps):
    x = x_ref[...]                          # (Bt*N, C) f32
    madd = madd_ref[...]                    # (Bt, N, N) f32 additive mask * log2(e)

    # ---- LayerNorm (norm1), f32 ----
    mu = jnp.mean(x, axis=-1, keepdims=True)
    xc = x - mu
    var = jnp.mean(xc * xc, axis=-1, keepdims=True)
    xn = xc * lax.rsqrt(var + eps)
    xn = xn * gamma_ref[...] + beta_ref[...]
    xn_bf = xn.astype(jnp.bfloat16)         # (Bt*N, C)

    proj_ref[...] = jnp.zeros_like(proj_ref)

    def head_body(h, carry):
        # q/k/v projections for head h: (Bt*N, C) @ (C, Dh), bf16 MXU, f32 acc.
        # (scale * log2e already folded into wq/bq host-side)
        q = jnp.dot(xn_bf, wq_ref[h], preferred_element_type=jnp.float32) + bq_ref[h]
        k = jnp.dot(xn_bf, wk_ref[h], preferred_element_type=jnp.float32) + bk_ref[h]
        v = jnp.dot(xn_bf, wv_ref[h], preferred_element_type=jnp.float32) + bv_ref[h]
        q3 = q.reshape(block_b, seq, head_dim).astype(jnp.bfloat16)
        k3 = k.reshape(block_b, seq, head_dim).astype(jnp.bfloat16)
        v3 = v.reshape(block_b, seq, head_dim).astype(jnp.bfloat16)

        # scores: contract last dims (no K transpose), mask is already additive
        s = jnp.einsum("bqd,bkd->bqk", q3, k3,
                       preferred_element_type=jnp.float32)           # (Bt, N, N)
        s = s + madd
        s = s - jnp.max(s, axis=-1, keepdims=True)
        p = jnp.exp2(s)                                               # unnormalized
        l = jnp.sum(p, axis=-1, keepdims=True)                        # (Bt, N, 1)

        o_h = jnp.einsum("bqk,bkd->bqd", p.astype(jnp.bfloat16), v3,
                         preferred_element_type=jnp.float32)          # (Bt, N, Dh)
        o_h = o_h / l                                                 # deferred softmax norm
        o2 = o_h.reshape(block_b * seq, head_dim).astype(jnp.bfloat16)

        # per-head slice of the output projection, accumulated lane-dense (width C)
        proj_ref[...] += jnp.dot(o2, wproj_ref[h],
                                 preferred_element_type=jnp.float32)
        return carry

    lax.fori_loop(0, num_heads, head_body, 0)

    # residual add (DropPath / dropout rates are 0.0 -> identity)
    o_ref[...] = (x + proj_ref[...] + bproj_ref[...]).astype(o_ref.dtype)


def _vmem_estimate_bytes(block_b, n, c, dh, h):
    """Rough lane-padded VMEM footprint of one grid step (double-buffered I/O)."""
    f32, bf16 = 4, 2
    lane = 128
    cl, nl, dl = max(c, lane), max(n, lane), max(dh, lane)
    rows = block_b * n
    est = 0
    est += 2 * rows * cl * f32                 # x block (double-buffered)
    est += 2 * rows * cl * f32                 # out block (double-buffered)
    est += 2 * block_b * n * nl * f32          # additive mask block (double-buffered)
    est += 2 * 3 * h * c * dl * bf16           # per-head q/k/v weight slabs
    est += 2 * h * max(dh, 8) * cl * bf16      # per-head proj weight slabs
    est += rows * cl * f32                     # proj accumulator scratch
    est += 3 * block_b * n * nl * f32          # score / prob temporaries
    est += 8 * rows * dl * f32                 # q/k/v/o per-head temporaries
    return est


def local_atten_module(x, atten_mask, params, *, num_heads, eps=1e-6):
    """x: (B, N, C) f32, atten_mask: (B, N, N) of 0/1 values (others pass through)."""
    B, N, C = x.shape
    assert C % num_heads == 0, "embed_dim must be divisible by num_heads"
    Dh = C // num_heads
    qscale = (Dh ** -0.5) * _LOG2E

    # ---- host-side parameter prep ----
    gamma = params["ln_gamma"].reshape(1, C).astype(jnp.float32)
    beta = params["ln_beta"].reshape(1, C).astype(jnp.float32)

    wqkv = params["w_qkv"]          # (3C, C)  rows ordered [q | k | v], head-major
    bqkv = params["b_qkv"]          # (3C,)

    def head_slab(w):               # (C, C)[out,in] -> (H, C_in, Dh) contraction-major
        return jnp.transpose(w.reshape(num_heads, Dh, C), (0, 2, 1))

    wq_h = (head_slab(wqkv[0 * C:1 * C]) * qscale).astype(jnp.bfloat16)   # scale folded
    wk_h = head_slab(wqkv[1 * C:2 * C]).astype(jnp.bfloat16)
    wv_h = head_slab(wqkv[2 * C:3 * C]).astype(jnp.bfloat16)
    bq_h = (bqkv[0 * C:1 * C].reshape(num_heads, 1, Dh) * qscale).astype(jnp.float32)
    bk_h = bqkv[1 * C:2 * C].reshape(num_heads, 1, Dh).astype(jnp.float32)
    bv_h = bqkv[2 * C:3 * C].reshape(num_heads, 1, Dh).astype(jnp.float32)
    # (C, C)[out,in] -> (H, Dh, C) so that proj = sum_h o_h @ wproj_h[h]
    wp_h = params["w_proj"].T.reshape(num_heads, Dh, C).astype(jnp.bfloat16)
    bp = params["b_proj"].reshape(1, C).astype(jnp.float32)

    # ---- additive attention mask precomputed once host-side (masked_fill
    #      semantics); kept f32 for exact pass-through, log2(e) folded in ----
    m = atten_mask.astype(jnp.float32)
    madd = jnp.where(m == 0, jnp.float32(-10000.0),
                     jnp.where(m == 1, jnp.float32(0.0), m)) * _LOG2E

    # ---- batch packing + explicit VMEM budget ----
    cap = 48 * 1024 * 1024          # safe under v7x's 64 MiB physical VMEM
    block_b = 1
    for bt in range(1, B + 1):
        if B % bt != 0 or bt * N > 512:
            continue
        if int(1.25 * _vmem_estimate_bytes(bt, N, C, Dh, num_heads)) <= cap:
            block_b = bt
    est = _vmem_estimate_bytes(block_b, N, C, Dh, num_heads)
    vmem_limit = int(min(cap, max(8 * 1024 * 1024, int(1.5 * est))))

    x2 = x.reshape(B * N, C)        # free XLA reshape; kernel works on 2-D row blocks
    rows = block_b * N

    kernel = functools.partial(_local_atten_kernel, num_heads=num_heads,
                               head_dim=Dh, block_b=block_b, seq=N, eps=eps)
    const2 = lambda b: (0, 0)
    const3 = lambda b: (0, 0, 0)

    out2 = pl.pallas_call(
        kernel,
        out_shape=jax.ShapeDtypeStruct((B * N, C), x.dtype),
        grid_spec=pltpu.PrefetchScalarGridSpec(
            num_scalar_prefetch=0,
            grid=(B // block_b,),
            in_specs=[
                pl.BlockSpec((rows, C), lambda b: (b, 0)),            # x rows
                pl.BlockSpec((block_b, N, N), lambda b: (b, 0, 0)),   # additive mask
                pl.BlockSpec((1, C), const2),                         # ln gamma
                pl.BlockSpec((1, C), const2),                         # ln beta
                pl.BlockSpec((num_heads, C, Dh), const3),             # W_q heads (scaled, bf16)
                pl.BlockSpec((num_heads, C, Dh), const3),             # W_k heads (bf16)
                pl.BlockSpec((num_heads, C, Dh), const3),             # W_v heads (bf16)
                pl.BlockSpec((num_heads, 1, Dh), const3),             # b_q heads (scaled)
                pl.BlockSpec((num_heads, 1, Dh), const3),             # b_k heads
                pl.BlockSpec((num_heads, 1, Dh), const3),             # b_v heads
                pl.BlockSpec((num_heads, Dh, C), const3),             # W_proj heads (bf16)
                pl.BlockSpec((1, C), const2),                         # b_proj
            ],
            out_specs=pl.BlockSpec((rows, C), lambda b: (b, 0)),
            scratch_shapes=[pltpu.VMEM((rows, C), jnp.float32)],      # proj accumulator
        ),
        compiler_params=pltpu.CompilerParams(
            dimension_semantics=("parallel",),
            vmem_limit_bytes=vmem_limit),
    )(x2, madd, gamma, beta, wq_h, wk_h, wv_h, bq_h, bk_h, bv_h, wp_h, bp)

    return out2.reshape(B, N, C)


def _reference(x, atten_mask, params, *, num_heads):
    """Plain-JAX (f32) re-implementation of LocalAttenModule.forward."""
    B, N, C = x.shape
    Dh = C // num_heads
    scale = Dh ** -0.5
    mu = jnp.mean(x, -1, keepdims=True)
    var = jnp.mean((x - mu) ** 2, -1, keepdims=True)
    xn = (x - mu) / jnp.sqrt(var + 1e-6) * params["ln_gamma"] + params["ln_beta"]
    qkv = xn @ params["w_qkv"].T + params["b_qkv"]                    # (B,N,3C)
    qkv = qkv.reshape(B, N, 3, num_heads, Dh).transpose(2, 0, 3, 1, 4)
    q, k, v = qkv[0], qkv[1], qkv[2]                                  # (B,H,N,Dh)
    attn = jnp.einsum("bhnd,bhmd->bhnm", q, k) * scale
    m = atten_mask
    madd = jnp.where(m == 0, -10000.0, jnp.where(m == 1, 0.0, m))
    attn = attn + madd[:, None, :, :]
    attn = jax.nn.softmax(attn, axis=-1)
    out = jnp.einsum("bhnm,bhmd->bhnd", attn, v)
    out = out.transpose(0, 2, 1, 3).reshape(B, N, C)
    out = out @ params["w_proj"].T + params["b_proj"]
    return x + out


def make_params(key, embed_dim):
    C = embed_dim
    k1, k2 = jax.random.split(key)
    # trunc_normal_(std=0.02) approximated by normal * 0.02; biases zero,
    # LayerNorm weight 1 / bias 0 (per _init_weights).
    return {
        "ln_gamma": jnp.ones((C,), jnp.float32),
        "ln_beta": jnp.zeros((C,), jnp.float32),
        "w_qkv": jax.random.normal(k1, (3 * C, C), jnp.float32) * 0.02,
        "b_qkv": jnp.zeros((3 * C,), jnp.float32),
        "w_proj": jax.random.normal(k2, (C, C), jnp.float32) * 0.02,
        "b_proj": jnp.zeros((C,), jnp.float32),
    }


if __name__ == "__main__":
    B, N, C, H = 2, 16, 32, 4

    key = jax.random.PRNGKey(0)
    kx, kp = jax.random.split(key)
    x = jax.random.normal(kx, (B, N, C), jnp.float32)

    # 0/1 local (banded) attention mask, window = 3.
    idx = jnp.arange(N)
    band = (jnp.abs(idx[:, None] - idx[None, :]) <= 3).astype(jnp.float32)
    atten_mask = jnp.broadcast_to(band, (B, N, N))

    params = make_params(kp, C)

    out = local_atten_module(x, atten_mask, params, num_heads=H)
    out = jax.block_until_ready(out)

    ref = _reference(x, atten_mask, params, num_heads=H)
    assert out.shape == (B, N, C)
    # bf16 MXU operands + exp2/deferred-norm softmax -> slightly loose tolerance.
    assert jnp.allclose(out, ref, atol=1e-2, rtol=1e-2), "mismatch vs reference"

    print("KERNEL_OK")
</pallas_src>

<mosaic_0001>
module attributes {stable_mosaic.version = 11 : i64} {
  func.func @_local_atten_kernel(%arg0: i32, %arg1: memref<32x32xf32, #tpu.memory_space<vmem>>, %arg2: memref<2x16x16xf32, #tpu.memory_space<vmem>>, %arg3: memref<1x32xf32, #tpu.memory_space<vmem>>, %arg4: memref<1x32xf32, #tpu.memory_space<vmem>>, %arg5: memref<4x32x8xbf16, #tpu.memory_space<vmem>>, %arg6: memref<4x32x8xbf16, #tpu.memory_space<vmem>>, %arg7: memref<4x32x8xbf16, #tpu.memory_space<vmem>>, %arg8: memref<4x1x8xf32, #tpu.memory_space<vmem>>, %arg9: memref<4x1x8xf32, #tpu.memory_space<vmem>>, %arg10: memref<4x1x8xf32, #tpu.memory_space<vmem>>, %arg11: memref<4x8x32xbf16, #tpu.memory_space<vmem>>, %arg12: memref<1x32xf32, #tpu.memory_space<vmem>>, %arg13: memref<32x32xf32, #tpu.memory_space<vmem>>, %arg14: memref<32x32xf32, #tpu.memory_space<vmem>>) attributes {dimension_semantics = [#tpu.dimension_semantics<parallel>], iteration_bounds = array<i64: 1>, scalar_prefetch = 0 : i64, scratch_operands = 1 : i64, tpu.core_type = #tpu.core_type<tc>, window_params = [{transform_indices = @transform_0, window_bounds = array<i64: 32, 32>}, {transform_indices = @transform_1, window_bounds = array<i64: 2, 16, 16>}, {pipeline_mode = #tpu.pipeline_mode<synchronous>, transform_indices = @transform_2, window_bounds = array<i64: 1, 32>}, {pipeline_mode = #tpu.pipeline_mode<synchronous>, transform_indices = @transform_3, window_bounds = array<i64: 1, 32>}, {pipeline_mode = #tpu.pipeline_mode<synchronous>, transform_indices = @transform_4, window_bounds = array<i64: 4, 32, 8>}, {pipeline_mode = #tpu.pipeline_mode<synchronous>, transform_indices = @transform_5, window_bounds = array<i64: 4, 32, 8>}, {pipeline_mode = #tpu.pipeline_mode<synchronous>, transform_indices = @transform_6, window_bounds = array<i64: 4, 32, 8>}, {pipeline_mode = #tpu.pipeline_mode<synchronous>, transform_indices = @transform_7, window_bounds = array<i64: 4, 1, 8>}, {pipeline_mode = #tpu.pipeline_mode<synchronous>, transform_indices = @transform_8, window_bounds = array<i64: 4, 1, 8>}, {pipeline_mode = #tpu.pipeline_mode<synchronous>, transform_indices = @transform_9, window_bounds = array<i64: 4, 1, 8>}, {pipeline_mode = #tpu.pipeline_mode<synchronous>, transform_indices = @transform_10, window_bounds = array<i64: 4, 8, 32>}, {pipeline_mode = #tpu.pipeline_mode<synchronous>, transform_indices = @transform_11, window_bounds = array<i64: 1, 32>}, {transform_indices = @transform_12, window_bounds = array<i64: 32, 32>}]} {
    %c0 = arith.constant 0 : index
    %c0_0 = arith.constant 0 : index
    %0 = vector.load %arg1[%c0, %c0_0] : memref<32x32xf32, #tpu.memory_space<vmem>>, vector<32x32xf32>
    %c0_1 = arith.constant 0 : index
    %c0_2 = arith.constant 0 : index
    %c0_3 = arith.constant 0 : index
    %1 = vector.load %arg2[%c0_1, %c0_2, %c0_3] : memref<2x16x16xf32, #tpu.memory_space<vmem>>, vector<2x16x16xf32>
    %cst = arith.constant dense<0.000000e+00> : vector<32xf32>
    %2 = vector.multi_reduction <add>, %0, %cst [1] : vector<32x32xf32> to vector<32xf32>
    %3 = vector.shape_cast %2 : vector<32xf32> to vector<32x1xf32>
    %cst_4 = arith.constant 3.200000e+01 : f32
    %4 = vector.broadcast %cst_4 : f32 to vector<32x1xf32>
    %5 = arith.divf %3, %4 : vector<32x1xf32>
    %6 = vector.broadcast %5 : vector<32x1xf32> to vector<32x32xf32>
    %7 = arith.subf %0, %6 : vector<32x32xf32>
    %8 = arith.mulf %7, %7 : vector<32x32xf32>
    %cst_5 = arith.constant dense<0.000000e+00> : vector<32xf32>
    %9 = vector.multi_reduction <add>, %8, %cst_5 [1] : vector<32x32xf32> to vector<32xf32>
    %10 = vector.shape_cast %9 : vector<32xf32> to vector<32x1xf32>
    %cst_6 = arith.constant 3.200000e+01 : f32
    %11 = vector.broadcast %cst_6 : f32 to vector<32x1xf32>
    %12 = arith.divf %10, %11 : vector<32x1xf32>
    %cst_7 = arith.constant 9.99999997E-7 : f32
    %13 = vector.broadcast %cst_7 : f32 to vector<32x1xf32>
    %14 = arith.addf %12, %13 : vector<32x1xf32>
    %15 = math.rsqrt %14 : vector<32x1xf32>
    %16 = vector.broadcast %15 : vector<32x1xf32> to vector<32x32xf32>
    %17 = arith.mulf %7, %16 : vector<32x32xf32>
    %c0_8 = arith.constant 0 : index
    %c0_9 = arith.constant 0 : index
    %18 = vector.load %arg3[%c0_8, %c0_9] : memref<1x32xf32, #tpu.memory_space<vmem>>, vector<1x32xf32>
    %19 = vector.broadcast %18 : vector<1x32xf32> to vector<32x32xf32>
    %20 = arith.mulf %17, %19 : vector<32x32xf32>
    %c0_10 = arith.constant 0 : index
    %c0_11 = arith.constant 0 : index
    %21 = vector.load %arg4[%c0_10, %c0_11] : memref<1x32xf32, #tpu.memory_space<vmem>>, vector<1x32xf32>
    %22 = vector.broadcast %21 : vector<1x32xf32> to vector<32x32xf32>
    %23 = arith.addf %20, %22 : vector<32x32xf32>
    %24 = arith.truncf %23 : vector<32x32xf32> to vector<32x32xbf16>
    %cst_12 = arith.constant 0.000000e+00 : f32
    %25 = vector.broadcast %cst_12 : f32 to vector<32x32xf32>
    %c0_13 = arith.constant 0 : index
    %c0_14 = arith.constant 0 : index
    %26 = vector.load %arg14[%c0_13, %c0_14] : memref<32x32xf32, #tpu.memory_space<vmem>>, vector<32x32xf32>
    tpu.vector_store %arg14[%c0_13, %c0_14], %25 {strides = array<i32>} : memref<32x32xf32, #tpu.memory_space<vmem>>, vector<32x32xf32>,
    %c0_i32 = arith.constant 0 : i32
    %c4_i32 = arith.constant 4 : i32
    %27 = arith.addi %c0_i32, %c4_i32 : i32
    %c1_i32 = arith.constant 1 : i32
    scf.for %arg15 = %c0_i32 to %27 step %c1_i32  : i32 {
      %34 = arith.index_cast %arg15 : i32 to index
      %c0_22 = arith.constant 0 : index
      %c0_23 = arith.constant 0 : index
      %35 = vector.load %arg5[%34, %c0_22, %c0_23] : memref<4x32x8xbf16, #tpu.memory_space<vmem>>, vector<1x32x8xbf16>
      %36 = vector.shape_cast %35 : vector<1x32x8xbf16> to vector<32x8xbf16>
      %cst_24 = arith.constant dense<0.000000e+00> : vector<32x8xf32>
      %37 = tpu.matmul %24, %36, %cst_24 {dimension_numbers = #tpu.dot_dimension_numbers<[1], [0], [0], [1], [0, 0, 1, 1], [], []>} : vector<32x32xbf16>, vector<32x8xbf16>, vector<32x8xf32> -> vector<32x8xf32>
      %38 = arith.index_cast %arg15 : i32 to index
      %c0_25 = arith.constant 0 : index
      %c0_26 = arith.constant 0 : index
      %39 = vector.load %arg8[%38, %c0_25, %c0_26] : memref<4x1x8xf32, #tpu.memory_space<vmem>>, vector<1x1x8xf32>
      %40 = vector.shape_cast %39 : vector<1x1x8xf32> to vector<1x8xf32>
      %41 = vector.broadcast %40 : vector<1x8xf32> to vector<32x8xf32>
      %42 = arith.addf %37, %41 : vector<32x8xf32>
      %43 = arith.index_cast %arg15 : i32 to index
      %c0_27 = arith.constant 0 : index
      %c0_28 = arith.constant 0 : index
      %44 = vector.load %arg6[%43, %c0_27, %c0_28] : memref<4x32x8xbf16, #tpu.memory_space<vmem>>, vector<1x32x8xbf16>
      %45 = vector.shape_cast %44 : vector<1x32x8xbf16> to vector<32x8xbf16>
      %cst_29 = arith.constant dense<0.000000e+00> : vector<32x8xf32>
      %46 = tpu.matmul %24, %45, %cst_29 {dimension_numbers = #tpu.dot_dimension_numbers<[1], [0], [0], [1], [0, 0, 1, 1], [], []>} : vector<32x32xbf16>, vector<32x8xbf16>, vector<32x8xf32> -> vector<32x8xf32>
      %47 = arith.index_cast %arg15 : i32 to index
      %c0_30 = arith.constant 0 : index
      %c0_31 = arith.constant 0 : index
      %48 = vector.load %arg9[%47, %c0_30, %c0_31] : memref<4x1x8xf32, #tpu.memory_space<vmem>>, vector<1x1x8xf32>
      %49 = vector.shape_cast %48 : vector<1x1x8xf32> to vector<1x8xf32>
      %50 = vector.broadcast %49 : vector<1x8xf32> to vector<32x8xf32>
      %51 = arith.addf %46, %50 : vector<32x8xf32>
      %52 = arith.index_cast %arg15 : i32 to index
      %c0_32 = arith.constant 0 : index
      %c0_33 = arith.constant 0 : index
      %53 = vector.load %arg7[%52, %c0_32, %c0_33] : memref<4x32x8xbf16, #tpu.memory_space<vmem>>, vector<1x32x8xbf16>
      %54 = vector.shape_cast %53 : vector<1x32x8xbf16> to vector<32x8xbf16>
      %cst_34 = arith.constant dense<0.000000e+00> : vector<32x8xf32>
      %55 = tpu.matmul %24, %54, %cst_34 {dimension_numbers = #tpu.dot_dimension_numbers<[1], [0], [0], [1], [0, 0, 1, 1], [], []>} : vector<32x32xbf16>, vector<32x8xbf16>, vector<32x8xf32> -> vector<32x8xf32>
      %56 = arith.index_cast %arg15 : i32 to index
      %c0_35 = arith.constant 0 : index
      %c0_36 = arith.constant 0 : index
      %57 = vector.load %arg10[%56, %c0_35, %c0_36] : memref<4x1x8xf32, #tpu.memory_space<vmem>>, vector<1x1x8xf32>
      %58 = vector.shape_cast %57 : vector<1x1x8xf32> to vector<1x8xf32>
      %59 = vector.broadcast %58 : vector<1x8xf32> to vector<32x8xf32>
      %60 = arith.addf %55, %59 : vector<32x8xf32>
      %61 = vector.shape_cast %42 : vector<32x8xf32> to vector<2x16x8xf32>
      %62 = arith.truncf %61 : vector<2x16x8xf32> to vector<2x16x8xbf16>
      %63 = vector.shape_cast %51 : vector<32x8xf32> to vector<2x16x8xf32>
      %64 = arith.truncf %63 : vector<2x16x8xf32> to vector<2x16x8xbf16>
      %65 = vector.shape_cast %60 : vector<32x8xf32> to vector<2x16x8xf32>
      %66 = arith.truncf %65 : vector<2x16x8xf32> to vector<2x16x8xbf16>
      "tpu.trace_start"() <{level = 10 : i32, message = "bqd,bkd->bqk"}> : () -> ()
      %cst_37 = arith.constant dense<0.000000e+00> : vector<2x16x16xf32>
      %67 = tpu.matmul %62, %64, %cst_37 {dimension_numbers = #tpu.dot_dimension_numbers<[2], [2], [1], [1], [0, 0, 0, 1, 1, 1], [0], [0]>} : vector<2x16x8xbf16>, vector<2x16x8xbf16>, vector<2x16x16xf32> -> vector<2x16x16xf32>
      "tpu.trace_stop"() : () -> ()
      %68 = arith.addf %67, %1 : vector<2x16x16xf32>
      %cst_38 = arith.constant dense<0xFF800000> : vector<2x16xf32>
      %69 = vector.multi_reduction <maximumf>, %68, %cst_38 [2] : vector<2x16x16xf32> to vector<2x16xf32>
      %70 = vector.shape_cast %69 : vector<2x16xf32> to vector<2x16x1xf32>
      %71 = vector.broadcast %70 : vector<2x16x1xf32> to vector<2x16x16xf32>
      %72 = arith.subf %68, %71 : vector<2x16x16xf32>
      %73 = math.exp2 %72 : vector<2x16x16xf32>
      %cst_39 = arith.constant dense<0.000000e+00> : vector<2x16xf32>
      %74 = vector.multi_reduction <add>, %73, %cst_39 [2] : vector<2x16x16xf32> to vector<2x16xf32>
      %75 = vector.shape_cast %74 : vector<2x16xf32> to vector<2x16x1xf32>
      %76 = arith.truncf %73 : vector<2x16x16xf32> to vector<2x16x16xbf16>
      "tpu.trace_start"() <{level = 10 : i32, message = "bqk,bkd->bqd"}> : () -> ()
      %cst_40 = arith.constant dense<0.000000e+00> : vector<2x16x8xf32>
      %77 = tpu.matmul %76, %66, %cst_40 {dimension_numbers = #tpu.dot_dimension_numbers<[2], [1], [1], [2], [0, 0, 0, 1, 1, 2], [0], [0]>} : vector<2x16x16xbf16>, vector<2x16x8xbf16>, vector<2x16x8xf32> -> vector<2x16x8xf32>
      "tpu.trace_stop"() : () -> ()
      %78 = vector.broadcast %75 : vector<2x16x1xf32> to vector<2x16x8xf32>
      %79 = arith.divf %77, %78 : vector<2x16x8xf32>
      %80 = vector.shape_cast %79 : vector<2x16x8xf32> to vector<32x8xf32>
      %81 = arith.truncf %80 : vector<32x8xf32> to vector<32x8xbf16>
      %c0_41 = arith.constant 0 : index
      %c0_42 = arith.constant 0 : index
      %82 = vector.load %arg14[%c0_41, %c0_42] : memref<32x32xf32, #tpu.memory_space<vmem>>, vector<32x32xf32>
      %83 = arith.index_cast %arg15 : i32 to index
      %c0_43 = arith.constant 0 : index
      %c0_44 = arith.constant 0 : index
      %84 = vector.load %arg11[%83, %c0_43, %c0_44] : memref<4x8x32xbf16, #tpu.memory_space<vmem>>, vector<1x8x32xbf16>
      %85 = vector.shape_cast %84 : vector<1x8x32xbf16> to vector<8x32xbf16>
      %cst_45 = arith.constant dense<0.000000e+00> : vector<32x32xf32>
      %86 = tpu.matmul %81, %85, %cst_45 {dimension_numbers = #tpu.dot_dimension_numbers<[1], [0], [0], [1], [0, 0, 1, 1], [], []>} : vector<32x8xbf16>, vector<8x32xbf16>, vector<32x32xf32> -> vector<32x32xf32>
      %87 = arith.addf %82, %86 : vector<32x32xf32>
      %c0_46 = arith.constant 0 : index
      %c0_47 = arith.constant 0 : index
      %88 = vector.load %arg14[%c0_46, %c0_47] : memref<32x32xf32, #tpu.memory_space<vmem>>, vector<32x32xf32>
      tpu.vector_store %arg14[%c0_46, %c0_47], %87 {strides = array<i32>} : memref<32x32xf32, #tpu.memory_space<vmem>>, vector<32x32xf32>,
    }
    %c4_i32_15 = arith.constant 4 : i32
    %c0_16 = arith.constant 0 : index
    %c0_17 = arith.constant 0 : index
    %28 = vector.load %arg14[%c0_16, %c0_17] : memref<32x32xf32, #tpu.memory_space<vmem>>, vector<32x32xf32>
    %29 = arith.addf %0, %28 : vector<32x32xf32>
    %c0_18 = arith.constant 0 : index
    %c0_19 = arith.constant 0 : index
    %30 = vector.load %arg12[%c0_18, %c0_19] : memref<1x32xf32, #tpu.memory_space<vmem>>, vector<1x32xf32>
    %31 = vector.broadcast %30 : vector<1x32xf32> to vector<32x32xf32>
    %32 = arith.addf %29, %31 : vector<32x32xf32>
    %c0_20 = arith.constant 0 : index
    %c0_21 = arith.constant 0 : index
    %33 = vector.load %arg13[%c0_20, %c0_21] : memref<32x32xf32, #tpu.memory_space<vmem>>, vector<32x32xf32>
    tpu.vector_store %arg13[%c0_20, %c0_21], %32 {strides = array<i32>} : memref<32x32xf32, #tpu.memory_space<vmem>>, vector<32x32xf32>,
    return
  }
  func.func @transform_0(%arg0: i32) -> (i32, i32) {
    %c0_i32 = arith.constant 0 : i32
    %c0_i32_0 = arith.constant 0 : i32
    return %arg0, %c0_i32 : i32, i32
  }
  func.func @transform_1(%arg0: i32) -> (i32, i32, i32) {
    %c0_i32 = arith.constant 0 : i32
    %c0_i32_0 = arith.constant 0 : i32
    %c0_i32_1 = arith.constant 0 : i32
    return %arg0, %c0_i32, %c0_i32_0 : i32, i32, i32
  }
  func.func @transform_2(%arg0: i32) -> (i32, i32) {
    %c0_i32 = arith.constant 0 : i32
    %c0_i32_0 = arith.constant 0 : i32
    %c0_i32_1 = arith.constant 0 : i32
    return %c0_i32, %c0_i32_0 : i32, i32
  }
  func.func @transform_3(%arg0: i32) -> (i32, i32) {
    %c0_i32 = arith.constant 0 : i32
    %c0_i32_0 = arith.constant 0 : i32
    %c0_i32_1 = arith.constant 0 : i32
    return %c0_i32, %c0_i32_0 : i32, i32
  }
  func.func @transform_4(%arg0: i32) -> (i32, i32, i32) {
    %c0_i32 = arith.constant 0 : i32
    %c0_i32_0 = arith.constant 0 : i32
    %c0_i32_1 = arith.constant 0 : i32
    %c0_i32_2 = arith.constant 0 : i32
    return %c0_i32, %c0_i32_0, %c0_i32_1 : i32, i32, i32
  }
  func.func @transform_5(%arg0: i32) -> (i32, i32, i32) {
    %c0_i32 = arith.constant 0 : i32
    %c0_i32_0 = arith.constant 0 : i32
    %c0_i32_1 = arith.constant 0 : i32
    %c0_i32_2 = arith.constant 0 : i32
    return %c0_i32, %c0_i32_0, %c0_i32_1 : i32, i32, i32
  }
  func.func @transform_6(%arg0: i32) -> (i32, i32, i32) {
    %c0_i32 = arith.constant 0 : i32
    %c0_i32_0 = arith.constant 0 : i32
    %c0_i32_1 = arith.constant 0 : i32
    %c0_i32_2 = arith.constant 0 : i32
    return %c0_i32, %c0_i32_0, %c0_i32_1 : i32, i32, i32
  }
  func.func @transform_7(%arg0: i32) -> (i32, i32, i32) {
    %c0_i32 = arith.constant 0 : i32
    %c0_i32_0 = arith.constant 0 : i32
    %c0_i32_1 = arith.constant 0 : i32
    %c0_i32_2 = arith.constant 0 : i32
    return %c0_i32, %c0_i32_0, %c0_i32_1 : i32, i32, i32
  }
  func.func @transform_8(%arg0: i32) -> (i32, i32, i32) {
    %c0_i32 = arith.constant 0 : i32
    %c0_i32_0 = arith.constant 0 : i32
    %c0_i32_1 = arith.constant 0 : i32
    %c0_i32_2 = arith.constant 0 : i32
    return %c0_i32, %c0_i32_0, %c0_i32_1 : i32, i32, i32
  }
  func.func @transform_9(%arg0: i32) -> (i32, i32, i32) {
    %c0_i32 = arith.constant 0 : i32
    %c0_i32_0 = arith.constant 0 : i32
    %c0_i32_1 = arith.constant 0 : i32
    %c0_i32_2 = arith.constant 0 : i32
    return %c0_i32, %c0_i32_0, %c0_i32_1 : i32, i32, i32
  }
  func.func @transform_10(%arg0: i32) -> (i32, i32, i32) {
    %c0_i32 = arith.constant 0 : i32
    %c0_i32_0 = arith.constant 0 : i32
    %c0_i32_1 = arith.constant 0 : i32
    %c0_i32_2 = arith.constant 0 : i32
    return %c0_i32, %c0_i32_0, %c0_i32_1 : i32, i32, i32
  }
  func.func @transform_11(%arg0: i32) -> (i32, i32) {
    %c0_i32 = arith.constant 0 : i32
    %c0_i32_0 = arith.constant 0 : i32
    %c0_i32_1 = arith.constant 0 : i32
    return %c0_i32, %c0_i32_0 : i32, i32
  }
  func.func @transform_12(%arg0: i32) -> (i32, i32) {
    %c0_i32 = arith.constant 0 : i32
    %c0_i32_0 = arith.constant 0 : i32
    return %arg0, %c0_i32 : i32, i32
  }
}

</mosaic_0001>

<bundles_post_ra>
// kernel: tpu_custom_call.1
= control target key start
LH: loop header
LB: loop body
LE: loop exit
PB: predicated region body
PF: predicated region fallthrough
CT: control target
= control target key end

     0   :  { %vm51_vm0 = vcmask 261120   ;;  %v920_v4 = vmov 0.0   ;;  %s1158_s0 = inlined_call_operand.vmem [shape: f32[32,32], index: 0, kind: input, shape index: {}]   ;;  %s1159_s1 = inlined_call_operand.vmem [shape: f32[2,16,16], index: 1, kind: input, shape index: {}]   ;;  %s1160_s2 = inlined_call_operand.vmem [shape: f32[1,32], index: 2, kind: input, shape index: {}]   ;;  %s1161_s3 = inlined_call_operand.vmem [shape: f32[1,32], index: 3, kind: input, shape index: {}]   ;;  %s1162_s4 = inlined_call_operand.vmem [shape: bf16[4,32,8], index: 4, kind: input, shape index: {}]   ;;  %s1163_s5 = inlined_call_operand.vmem [shape: bf16[4,32,8], index: 5, kind: input, shape index: {}]   ;;  %s1164_s6 = inlined_call_operand.vmem [shape: bf16[4,32,8], index: 6, kind: input, shape index: {}]   ;;  %s1165_s7 = inlined_call_operand.vmem [shape: f32[4,1,8], index: 7, kind: input, shape index: {}]   ;;  %s1166_s8 = inlined_call_operand.vmem [shape: f32[4,1,8], index: 8, kind: input, shape index: {}]   ;;  %s1167_s9 = inlined_call_operand.vmem [shape: f32[4,1,8], index: 9, kind: input, shape index: {}]   ;;  %s1168_s10 = inlined_call_operand.vmem [shape: bf16[4,8,32], index: 10, kind: input, shape index: {}]   ;;  %s1169_s11 = inlined_call_operand.vmem [shape: f32[1,32], index: 11, kind: input, shape index: {}]   ;;  %s1170_s12 = inlined_call_operand.hbm [shape: f32[32,32], index: 12, kind: output, shape index: {}]  }
   0x1   :  { %v994_v0 = vld [vmem:[%s1158_s0] sm:$0xff]  ;;  %v999_v1 = vld [vmem:[%s1158_s0 + $0x10] sm:$0xff]  ;;  %v1004_v2 = vld [vmem:[%s1158_s0 + $0x8] sm:$0xff]  ;;  %129 = vst.msk [vmem:[#allocation2] sm:$0xff] %vm51_vm0, %v920_v4 }
   0x2   :  { %v52_v3 = vsel %vm51_vm0, %v994_v0, 0.0  ;;  %130 = vst.msk [vmem:[#allocation2 + $0x8] sm:$0xff] %vm51_vm0, %v920_v4  ;;  %131 = vst.msk [vmem:[#allocation2 + $0x10] sm:$0xff] %vm51_vm0, %v920_v4  ;;  %v58_v5 = vsel %vm51_vm0, %v999_v1, 0.0  ;;  %v1017_v6 = vld [vmem:[%s1158_s0 + $0x18] sm:$0xff] }
   0x3   :  { %132 = vst.msk [vmem:[#allocation2 + $0x18] sm:$0xff] %vm51_vm0, %v920_v4 }
   0x4   :  { %17 = vsyncpa [#allocation4], 0  ;;  %53 = vadd.xlane.f32.xlu0 %v52_v3  ;;  %59 = vadd.xlane.f32.xlu1 %v58_v5  ;;  %v55_v7 = vsel %vm51_vm0, %v1004_v2, 0.0  ;;  %v61_v8 = vsel %vm51_vm0, %v1017_v6, 0.0  ;;  %v1034_v29 = vld [vmem:[%s1159_s1] sm:$0xff]  ;;  %v1039_v30 = vld [vmem:[%s1159_s1 + $0x8] sm:$0xff] }
   0x5   :  { %v1044_v31 = vld [vmem:[%s1159_s1 + $0x10] sm:$0xff]  ;;  %v1049_v32 = vld [vmem:[%s1159_s1 + $0x18] sm:$0xff]  ;;  %v734_v47 = vld [vmem:[%s1160_s2] ss:$0 sm:$0xff]  ;;  %s1061_s2 = smov 0  }
   0x6   :  { %v735_v52 = vld [vmem:[%s1161_s3] ss:$0 sm:$0xff] }
   0x8   :  { %56 = vadd.xlane.f32.xlu0 %v55_v7  ;;  %62 = vadd.xlane.f32.xlu1 %v61_v8 }
  0x91   :  { %v54_v9 = vpop.xlane.xlu0 %53  ;;  %v60_v10 = vpop.xlane.xlu1 %59 }
  0x92   :  { %v65_v11 = vmul.f32 0.03125, %v54_v9  ;;  %v67_v12 = vmul.f32 0.03125, %v60_v10 }
  0x94   :  { %v69_v13 = vsub.f32 %v994_v0, %v65_v11  ;;  %v71_v14 = vsub.f32 %v999_v1, %v67_v12 }
  0x95   :  { %v57_v15 = vpop.xlane.xlu0 %56  ;;  %v63_v16 = vpop.xlane.xlu1 %62 }
  0x96   :  { %v66_v17 = vmul.f32 0.03125, %v57_v15  ;;  %v68_v18 = vmul.f32 0.03125, %v63_v16  ;;  %v73_v19 = vmul.f32 %v69_v13, %v69_v13  ;;  %v75_v20 = vmul.f32 %v71_v14, %v71_v14 }
  0x98   :  { %v70_v21 = vsub.f32 %v1004_v2, %v66_v17  ;;  %v72_v22 = vsub.f32 %v1017_v6, %v68_v18  ;;  %v77_v23 = vsel %vm51_vm0, %v73_v19, 0.0  ;;  %v83_v24 = vsel %vm51_vm0, %v75_v20, 0.0 }
  0x99   :  { %78 = vadd.xlane.f32.xlu0 %v77_v23 }
  0x9a   :  { %v74_v25 = vmul.f32 %v70_v21, %v70_v21  ;;  %v76_v26 = vmul.f32 %v72_v22, %v72_v22 }
  0x9c   :  { %v80_v27 = vsel %vm51_vm0, %v74_v25, 0.0  ;;  %v86_v28 = vsel %vm51_vm0, %v76_v26, 0.0 }
  0x9d   :  { %84 = vadd.xlane.f32.xlu0 %v83_v24  ;;  %81 = vadd.xlane.f32.xlu1 %v80_v27 }
  0xa1   :  { %87 = vadd.xlane.f32.xlu1 %v86_v28 }
 0x126   :  { %v79_v33 = vpop.xlane.xlu0 %78 }
 0x127   :  { %v89_v34 = vmul.f32 0.03125, %v79_v33 }
 0x129   :  { %v93_v35 = vadd.f32 1e-06, %v89_v34 }
 0x12a   :  { %v82_v36 = vpop.xlane.xlu1 %81  ;;  %v85_v37 = vpop.xlane.xlu0 %84 }
 0x12b   :  { %858 = vrsqrt.f32 %v93_v35  ;;  %v90_v38 = vmul.f32 0.03125, %v82_v36  ;;  %v91_v39 = vmul.f32 0.03125, %v85_v37 }
 0x12d   :  { %v94_v40 = vadd.f32 1e-06, %v90_v38  ;;  %v95_v41 = vadd.f32 1e-06, %v91_v39 }
 0x12e   :  { %v88_v42 = vpop.xlane.xlu1 %87 }
 0x12f   :  { %860 = vrsqrt.f32 %v94_v40  ;;  %v92_v43 = vmul.f32 0.03125, %v88_v42 }
 0x130   :  { %862 = vrsqrt.f32 %v95_v41 }
 0x131   :  { %v96_v44 = vadd.f32 1e-06, %v92_v43 }
 0x133   :  { %864 = vrsqrt.f32 %v96_v44 }
 0x135   :  { %v859_v45 = vpop.eup %858 }
 0x136   :  { %v101_v46 = vmul.f32 %v859_v45, %v69_v13 }
 0x138   :  { %v112_v50 = vmul.f32 %v734_v47, %v101_v46 }
 0x139   :  { %v861_v48 = vpop.eup %860 }
 0x13a   :  { %v863_v49 = vpop.eup %862  ;;  %v102_v51 = vmul.f32 %v861_v48, %v70_v21  ;;  %v123_v56 = vadd.f32 %v735_v52, %v112_v50 }
 0x13b   :  { %v103_v53 = vmul.f32 %v863_v49, %v71_v14 }
 0x13c   :  { %v113_v54 = vmul.f32 %v734_v47, %v102_v51 }
 0x13d   :  { %v865_v55 = vpop.eup %864  ;;  %v114_v58 = vmul.f32 %v734_v47, %v103_v53 }
 0x13e   :  { %v124_v57 = vadd.f32 %v735_v52, %v113_v54  ;;  %v104_v59 = vmul.f32 %v865_v55, %v72_v22 }
 0x13f   :  { %v125_v62 = vadd.f32 %v735_v52, %v114_v58 }
 0x140   :  { %v1057_v60 = vpack.c.bf16 %v124_v57, %v123_v56  ;;  %v115_v61 = vmul.f32 %v734_v47, %v104_v59 }
 0x142   :  { %v126_v63 = vadd.f32 %v735_v52, %v115_v61 }
 0x144   :  { %v1059_v3 = vpack.c.bf16 %v126_v63, %v125_v62 }
 0x145 LB: > { %801 = vmatprep.mubr.msk.bf16.mxu1 %vm51_vm0, %v1057_v60  ;;  %793 = vmatprep.mubr.msk.bf16.mxu0 %vm51_vm0, %v1057_v60  ;;  %s763_s3 = sshll.u32 %s918_s2, 4  ;;  %v921_v11 = vmov 0.0   ;;  %vm922_vm1 = vmmov 0   ;;  %s227_s13 = scalar_lea.vmem %s1166_s8, %s918_s2  ;;  %vm377_vm2 = vcmask 64512   ;;  %vm472_vm3 = vcmask 130048   ;;  %s918_s2 = sphi %s1061_s2, %s138_s2  }
 0x146   : > { %s222_s23 = scalar_lea.vmem %s1163_s5, %s763_s3  ;;  %s141_s26 = scalar_lea.vmem %s1162_s4, %s763_s3  ;;  %v744_v13 = vld [vmem:[%s227_s13] ss:$0 sm:$0xff]  ;;  %vm618_vm4 = vcmask 1043456  }
 0x147   : > { %v866_v4 = vld [vmem:[%s222_s23] sm:$0xff]   ;;  %v867_v5 = vld [vmem:[%s222_s23 + $0x8] sm:$0xff]   ;;  %s297_s0 = scalar_lea.vmem %s1164_s6, %s763_s3  ;;  %s146_s16 = scalar_lea.vmem %s1165_s7, %s918_s2 }
 0x148   : > { %797 = vmatprep.subr.bf16.mxu1 %v866_v4  ;;  %v868_v7 = vld [vmem:[%s141_s26] sm:$0xff]   ;;  %v869_v8 = vld [vmem:[%s141_s26 + $0x8] sm:$0xff]   ;;  %s302_s18 = scalar_lea.vmem %s1167_s9, %s918_s2  ;;  %s759_s19 = sshll.u32 %s918_s2, 2 }
 0x149   : > { %798 = vmatpush3.bf16.msra.mxu1 %v866_v4  ;;  %789 = vmatprep.subr.bf16.mxu0 %v868_v7  ;;  %v870_v9 = vld [vmem:[%s297_s0] sm:$0xff]   ;;  %v871_v10 = vld [vmem:[%s297_s0 + $0x8] sm:$0xff]   ;;  %s610_s21 = scalar_lea.vmem %s1168_s10, %s759_s19  ;;  %s138_s2 = sadd.s32 1, %s918_s2  }
 0x14a   : > { %799 = vmatprep.subr.bf16.mxu1 %v867_v5  ;;  %790 = vmatpush3.bf16.msra.mxu0 %v868_v7  ;;  %v738_v14 = vld [vmem:[%s146_s16] ss:$0 sm:$0xff]  ;;  %p135_p0 = scmp.ge.s32.totalorder %s138_s2, 4  }
 0x14b   : > { %791 = vmatprep.subr.bf16.mxu0 %v869_v8  ;;  %v750_v40 = vld [vmem:[%s302_s18] ss:$0 sm:$0xff]  ;;  %s923_s24 = smov (%p135_p0), [#allocation3]  }
 0x14c   :  { %s707_s25 = sshll.u32 (%p135_p0), %s923_s24, 4  ;;  %s708_s25 = int_to_ptr.vmem [resolvable:$true] %s707_s25 }
 0x14d   : > { %800 = vmatpush3.bf16.msra.mxu1 %v867_v5  ;;  %s888_s4 = scalar_lea.vmem (%p135_p0), %s708_s25, 512  ;;  %p893_p2 = scmp.lt.s32.totalorder (%p135_p0), %s708_s25, %s708_s25 }
 0x14e   : > { %792 = vmatpush3.bf16.msra.mxu0 %v869_v8  ;;  %813 = vmatprep.subr.bf16.mxu1 %v921_v11  ;;  %p889_p1 = scmp.ne.s32.totalorder (%p135_p0), %s708_s25, %s888_s4  ;;  %p894_p3 = scmp.lt.s32.totalorder (%p135_p0), %s888_s4, %s888_s4 }
 0x14f   : > { %805 = vmatprep.subr.bf16.mxu0 %v870_v9 }
 0x150   : > { %802 = vmatmul.mubr.msk.bf16.vlgmr.msra.gmra.mrb[0].mxu1 %vm51_vm0, %v1059_v3  ;;  %p895_p4 = por (%p135_p0), %p894_p3, %p893_p2 }
 0x151   : > { %794 = vmatmul.mubr.msk.bf16.vlgmr.msra.gmra.mrb[0].mxu0 %vm51_vm0, %v1059_v3  ;;  %815 = vmatprep.mubr.msk.bf16.mxu1 %vm922_vm1, %v921_v11 }
 0x152   : > { %806 = vmatpush3.bf16.msra.mxu0 %v870_v9  ;;  %809 = vmatprep.mubr.msk.bf16.mxu0 %vm51_vm0, %v1057_v60  ;;  %p896_p5 = pnand (%p135_p0), %p895_p4, %p889_p1 }
 0x153   : > { %807 = vmatprep.subr.bf16.mxu0 %v871_v10 }
 0x156   : > { %808 = vmatpush3.bf16.msra.mxu0 %v871_v10 }
 0x157   : > { %819 = vmatprep.subr.bf16.mxu0 %v921_v11 }
 0x159   : > { %810 = vmatmul.mubr.msk.bf16.vlgmr.msra.gmra.mrb[4].mxu0 %vm51_vm0, %v1059_v3 }
 0x15a   : > { %821 = vmatprep.mubr.msk.bf16.mxu0 %vm922_vm1, %v921_v11 }
 0x223   : > { %v803_v12 = vpop.f32.mrb[0].mxu1 }
 0x224   : > { %v281_v15 = vpop.f32.mrb[1].mxu1  ;;  %v795_v17 = vpop.f32.mrb[0].mxu0  ;;  %v290_v18 = vadd.f32 %v803_v12, %v744_v13 }
 0x225   : > { %v804_v16 = vpop.f32.mrb[2].mxu1  ;;  %v215_v21 = vadd.f32 %v795_v17, %v738_v14  ;;  %v206_v22 = vpop.f32.mrb[1].mxu0  ;;  %v282_v23 = vadd.f32 %v744_v13, %v281_v15 }
 0x226   : > { %v293_v19 = vadd.f32 %v804_v16, %v744_v13  ;;  %v284_v20 = vpop.f32.mrb[3].mxu1  ;;  %v207_v25 = vadd.f32 %v738_v14, %v206_v22  ;;  %v796_v26 = vpop.f32.mrb[2].mxu0 }
 0x227   : > { %v285_v24 = vadd.f32 %v744_v13, %v284_v20  ;;  %v218_v28 = vadd.f32 %v796_v26, %v738_v14  ;;  %v209_v33 = vpop.f32.mrb[3].mxu0 }
 0x228   : > { %v374_v27 = vpack.c.bf16 %v293_v19, %v290_v18  ;;  %v210_v35 = vadd.f32 %v738_v14, %v209_v33 }
 0x229   : > { %v373_v34 = vpack.c.bf16 %v285_v24, %v282_v23  ;;  %v372_v36 = vpack.c.bf16 %v218_v28, %v215_v21 }
 0x22a   : > { %v429_v37 = vsel %vm377_vm2, %v374_v27, 0  ;;  %v371_v38 = vpack.c.bf16 %v210_v35, %v207_v25  ;;  %v611_v27 = vld [vmem:[%s610_s21] sm:$0xf] }
 0x22b   : > { %820 = vmatpush3.bf16.xpose.msra.mxu0 %v429_v37  ;;  %v382_v39 = vsel %vm377_vm2, %v373_v34, 0  ;;  %v620_v28 = vsel %vm618_vm4, %v611_v27, 0 }
 0x22c   : > { %814 = vmatpush3.bf16.xpose.msra.mxu1 %v382_v39  ;;  %831 = vmatprep.subr.bf16.mxu0 %v921_v11  ;;  %v811_v41 = vpop.f32.mrb[4].mxu0 }
 0x22d   : > { %825 = vmatprep.subr.bf16.mxu1 %v921_v11  ;;  %v365_v42 = vadd.f32 %v811_v41, %v750_v40  ;;  %v356_v43 = vpop.f32.mrb[5].mxu0 }
 0x22e   : > { %v357_v44 = vadd.f32 %v750_v40, %v356_v43  ;;  %v812_v45 = vpop.f32.mrb[6].mxu0 }
 0x22f   : > { %v368_v46 = vadd.f32 %v812_v45, %v750_v40  ;;  %v359_v47 = vpop.f32.mrb[7].mxu0 }
 0x230   : > { %v360_v48 = vadd.f32 %v750_v40, %v359_v47 }
 0x231   : > { %v376_v49 = vpack.c.bf16 %v368_v46, %v365_v42 }
 0x232   : > { %822 = vmatmul.mubr.msk.bf16.vlgmr.msra.gmra.mrb[8].mxu0 %vm377_vm2, %v372_v36  ;;  %v375_v50 = vpack.c.bf16 %v360_v48, %v357_v44 }
 0x233   : > { %816 = vmatmul.mubr.msk.bf16.vlgmr.msra.gmra.mrb[4].mxu1 %vm377_vm2, %v371_v38  ;;  %833 = vmatprep.mubr.msk.bf16.mxu0 %vm922_vm1, %v921_v11 }
 0x234   : > { %832 = vmatpush3.bf16.msra.mxu0 %v376_v49  ;;  %827 = vmatprep.mubr.msk.bf16.mxu1 %vm922_vm1, %v921_v11 }
 0x235   : > { %826 = vmatpush3.bf16.msra.mxu1 %v375_v50 }
 0x236   : > { %843 = vmatprep.subr.msk.bf16.mxu1 %vm618_vm4, %v611_v27 }
 0x305   : > { %v465_v51 = vpop.f32.mrb[8].mxu0 }
 0x306   : > { %v466_v52 = vadd.f32 %v465_v51, %v1044_v31  ;;  %v418_v53 = vpop.f32.mrb[4].mxu1  ;;  %v823_v54 = vpop.f32.mrb[9].mxu0 }
 0x307   : > { %v419_v55 = vadd.f32 %v418_v53, %v1034_v29  ;;  %v817_v56 = vpop.f32.mrb[5].mxu1  ;;  %v468_v57 = vpop.f32.mrb[10].mxu0 }
 0x308   : > { %v469_v58 = vadd.f32 %v468_v57, %v1049_v32  ;;  %v421_v59 = vpop.f32.mrb[6].mxu1  ;;  %v824_v61 = vpop.f32.mrb[11].mxu0  ;;  %v479_v62 = vsel %vm472_vm3, %v466_v52, -inf  ;;  %v605_v56 = vld [vmem:[#allocation2] sm:$0xff] }
 0x309   : > { %v422_v63 = vadd.f32 %v421_v59, %v1039_v30  ;;  %480 = vmax.xlane.f32.xlu1 %v479_v62  ;;  %v818_v4 = vpop.f32.mrb[7].mxu1  ;;  %v473_v5 = vsel %vm472_vm3, %v419_v55, -inf  ;;  %v606_v62 = vld [vmem:[#allocation2 + $0x8] sm:$0xff] }
 0x30a   : > { %474 = vmax.xlane.f32.xlu0 %v473_v5  ;;  %v482_v7 = vsel %vm472_vm3, %v469_v58, -inf }
 0x30b   : > { %v476_v8 = vsel %vm472_vm3, %v422_v63, -inf }
 0x30d   : > { %483 = vmax.xlane.f32.xlu1 %v482_v7 }
 0x30e   : > { %477 = vmax.xlane.f32.xlu0 %v476_v8 }
 0x396   : > { %v481_v9 = vpop.xlane.xlu1 %480 }
 0x397   : > { %v475_v10 = vpop.xlane.xlu0 %474  ;;  %v487_v11 = vsub.f32 %v466_v52, %v481_v9 }
 0x398   : > { %v485_v12 = vsub.f32 %v419_v55, %v475_v10  ;;  %v607_v55 = vld [vmem:[#allocation2 + $0x10] sm:$0xff]  ;;  %v762_v10 = vld [vmem:[%s1169_s11] ss:$0 sm:$0xff] (%p135_p0) }
 0x39a   : > { %872 = vpow2.f32 %v485_v12  ;;  %v484_v13 = vpop.xlane.xlu1 %483 }
 0x39b   : > { %v488_v14 = vsub.f32 %v469_v58, %v484_v13  ;;  %v478_v15 = vpop.xlane.xlu0 %477  ;;  %874 = vpow2.f32 %v487_v11  ;;  %v608_v58 = vld [vmem:[#allocation2 + $0x18] sm:$0xff] }
 0x39c   : > { %v486_v16 = vsub.f32 %v422_v63, %v478_v15 }
 0x39d   : > { %876 = vpow2.f32 %v488_v14 }
 0x39e   : > { %878 = vpow2.f32 %v486_v16 }
 0x3a4   : > { %v873_v17 = vpop.eup %872 }
 0x3a5   : > { %v493_v18 = vsel %vm472_vm3, %v873_v17, 0.0  ;;  %v875_v19 = vpop.eup %874 }
 0x3a6   : > { %494 = vadd.xlane.f32.xlu0 %v493_v18  ;;  %v499_v23 = vsel %vm472_vm3, %v875_v19, 0.0 }
 0x3a7   : > { %v877_v20 = vpop.eup %876 }
 0x3a8   : > { %v879_v21 = vpop.eup %878  ;;  %v506_v22 = vpack.c.bf16 %v877_v20, %v875_v19  ;;  %v502_v26 = vsel %vm472_vm3, %v877_v20, 0.0 }
 0x3a9   : > { %v496_v24 = vsel %vm472_vm3, %v879_v21, 0.0  ;;  %v505_v25 = vpack.c.bf16 %v879_v21, %v873_v17 }
 0x3aa   : > { %834 = vmatmul.mubr.msk.bf16.vlgmr.msra.gmra.mrb[12].mxu0 %vm472_vm3, %v506_v22  ;;  %500 = vadd.xlane.f32.xlu0 %v499_v23 }
 0x3ab   : > { %497 = vadd.xlane.f32.xlu1 %v496_v24  ;;  %828 = vmatmul.mubr.msk.bf16.vlgmr.msra.gmra.mrb[8].mxu1 %vm472_vm3, %v505_v25 }
 0x3ac   : > { %838 = vmatpush3.bf16.msra.mxu1 %v620_v28 }
 0x3af   : > { %503 = vadd.xlane.f32.xlu1 %v502_v26 }
 0x433   : > { %v495_v33 = vpop.xlane.xlu0 %494 }
 0x434   : > { %880 = vrcp.f32 %v495_v33 }
 0x437   : > { %v501_v35 = vpop.xlane.xlu0 %500 }
 0x438   : > { %v498_v34 = vpop.xlane.xlu1 %497  ;;  %882 = vrcp.f32 %v501_v35 }
 0x43c   : > { %v504_v36 = vpop.xlane.xlu1 %503 }
 0x43d   : > { %884 = vrcp.f32 %v504_v36 }
 0x43e   : > { %886 = vrcp.f32 %v498_v34  ;;  %v881_v37 = vpop.eup %880 }
 0x442   : > { %v883_v39 = vpop.eup %882 }
 0x447   : > { %v885_v42 = vpop.eup %884 }
 0x448   : > { %v887_v45 = vpop.eup %886 }
 0x47d   : > { %v588_v38 = vpop.f32.mrb[12].mxu0 }
 0x47e   : > { %v544_v40 = vpop.f32.mrb[8].mxu1  ;;  %v835_v41 = vpop.f32.mrb[13].mxu0  ;;  %v600_v46 = vmul.f32 %v883_v39, %v588_v38 }
 0x47f   : > { %v829_v43 = vpop.f32.mrb[9].mxu1  ;;  %v591_v44 = vpop.f32.mrb[14].mxu0  ;;  %v596_v50 = vmul.f32 %v881_v37, %v544_v40 }
 0x480   : > { %v602_v47 = vmul.f32 %v885_v42, %v591_v44  ;;  %v547_v48 = vpop.f32.mrb[10].mxu1  ;;  %v836_v49 = vpop.f32.mrb[15].mxu0 }
 0x481   : > { %v598_v51 = vmul.f32 %v887_v45, %v547_v48  ;;  %v830_v52 = vpop.f32.mrb[11].mxu1 }
 0x482   : > { %v604_v53 = vpack.c.bf16 %v602_v47, %v600_v46 }
 0x483   : > { %v603_v54 = vpack.c.bf16 %v598_v51, %v596_v50 }
 0x485   : > { %839 = vmatprep.mubr.msk.bf16.mxu1 %vm377_vm2, %v603_v54 }
 0x486   : > { %840 = vmatmul.mubr.msk.bf16.vlgmr.msra.gmra.mrb[12].mxu1 %vm377_vm2, %v604_v53 }
 0x559   : > { %v841_v57 = vpop.f32.mrb[12].mxu1  ;;  %137 = sbr.rel (!%p135_p0) target bundleno = 325 (0x145), region = 82 }
 0x55a   : > { %v673_v59 = vadd.f32 %v841_v57, %v607_v55  ;;  %v656_v61 = vpop.f32.mrb[13].mxu1 }
 0x55b   : > { %v671_v63 = vadd.f32 %v656_v61, %v605_v56  ;;  %v842_v4 = vpop.f32.mrb[14].mxu1 }
 0x55c   : > { %677 = vst.msk [vmem:[#allocation2 + $0x10] sm:$0xff] %vm51_vm0, %v673_v59  ;;  %v674_v5 = vadd.f32 %v842_v4, %v608_v58  ;;  %v659_v7 = vpop.f32.mrb[15].mxu1 }
 0x55d   : > { %675 = vst.msk [vmem:[#allocation2] sm:$0xff] %vm51_vm0, %v671_v63  ;;  %v672_v8 = vadd.f32 %v659_v7, %v606_v62 }
 0x55e   : > { %678 = vst.msk [vmem:[#allocation2 + $0x18] sm:$0xff] %vm51_vm0, %v674_v5 }
 0x55f   : > { %676 = vst.msk [vmem:[#allocation2 + $0x8] sm:$0xff] %vm51_vm0, %v672_v8 }
 0x563   :  { %v681_v14 = vld [vmem:[#allocation2 + $0x10] sm:$0xff] }
 0x564   :  { %v679_v9 = vld [vmem:[#allocation2] sm:$0xff]  ;;  %v685_v16 = vadd.f32 %v681_v14, %v999_v1 }
 0x565   :  { %v683_v12 = vadd.f32 %v679_v9, %v994_v0  ;;  %v682_v15 = vld [vmem:[#allocation2 + $0x18] sm:$0xff] }
 0x566   :  { %v680_v11 = vld [vmem:[#allocation2 + $0x8] sm:$0xff]  ;;  %v686_v17 = vadd.f32 %v682_v15, %v1017_v6  ;;  %v696_v29 = vadd.f32 %v762_v10, %v685_v16 }
 0x567   :  { %v684_v13 = vadd.f32 %v680_v11, %v1004_v2  ;;  %v694_v18 = vadd.f32 %v762_v10, %v683_v12 }
 0x568   :  { %v697_v30 = vadd.f32 %v762_v10, %v686_v17  ;;  %700 = vst.msk [vmem:[#allocation3 + $0x10] sm:$0xff] %vm51_vm0, %v696_v29 }
 0x569   :  { %v695_v19 = vadd.f32 %v762_v10, %v684_v13  ;;  %698 = vst.msk [vmem:[#allocation3] sm:$0xff] %vm51_vm0, %v694_v18 }
 0x56a   :  { %701 = vst.msk [vmem:[#allocation3 + $0x18] sm:$0xff] %vm51_vm0, %v697_v30 }
 0x56b   :  { %699 = vst.msk [vmem:[#allocation3 + $0x8] sm:$0xff] %vm51_vm0, %v695_v19 }
 0x56c   :  { %899 = shalt.err (!%p896_p5)
}
 0x56d   :  { %s900_s7 = scalar_lea.hbm %s1170_s12, 512 }
 0x56e   :  { %p901_p6 = scmp.ne.s32.totalorder %s1170_s12, %s900_s7  ;;  %p904_p7 = scmp.lt.u32.totalorder %s900_s7, %s1170_s12 }
 0x570   :  { %p906_p8 = pnand %p904_p7, %p901_p6 }
 0x572   :  { %909 = shalt.err (!%p906_p8)
}
 0x573   :  { %s924_s2 = smov 128   ;;  %s925_s26 = smov 8  }
 0x574   :  { %713 = dma.vmem_to_hbm [thread:$0]  %s708_s25, 512, %s1170_s12, [#allocation4], %s924_s2, %s924_s2, %s925_s26  }
 0x575   :  { %914 = dma.done.wait [#allocation4], 512  }
 0x576   :  { %915 = vsyncadd [#allocation4], 4294966784 }
 0x577   :  { %717 = vsyncpa [#allocation4], 1 }

</bundles_post_ra>
